<compile_context>
chip_gen: v7x
topology: tpu7x:2x2x1
jax: 0.10.0
libtpu: 0.0.40
codegen_flags: <defaults>
</compile_context>

<pallas_src>
import functools
import math

import numpy as np

import jax
import jax.numpy as jnp
from jax.experimental import pallas as pl
from jax.experimental.pallas import tpu as pltpu


# ----------------------------------------------------------------------------
# Kernels
# ----------------------------------------------------------------------------

def _layernorm_kernel_k1(x_ref, gamma_ref, beta_ref, o_ref, *, eps, feat):
    """Plain path: one logical row per kernel row.  x_ref: (row_tile, feat)."""
    x = x_ref[...].astype(jnp.float32)
    g = gamma_ref[...].astype(jnp.float32)
    b = beta_ref[...].astype(jnp.float32)

    inv_n = jnp.float32(1.0 / feat)
    inv_nm1 = jnp.float32(1.0 / (feat - 1)) if feat > 1 else jnp.float32(jnp.nan)

    mean = jnp.sum(x, axis=-1, keepdims=True) * inv_n
    diff = x - mean
    var = jnp.sum(diff * diff, axis=-1, keepdims=True) * inv_nm1
    # Precise reciprocal: mem-bound kernel, divide latency is hidden anyway.
    inv = pl.reciprocal(var + jnp.float32(eps), approx=False)
    o_ref[...] = (g * diff * inv + b).astype(o_ref.dtype)


def _layernorm_kernel_folded(x_ref, gamma_ref, beta_ref, s_ref, st_ref, o_ref,
                             *, eps, feat):
    """Lane-folded path: each kernel row holds k logical rows of `feat`
    features laid out contiguously along the (k*feat)-lane dimension.

    x_ref: (row_tile, k*feat); gamma/beta: (1, k*feat)
    s_ref: (k*feat, k) segment-select matrix, st_ref: (k, k*feat) = S.T
    (built once on the host, resident across grid steps).
    """
    x = x_ref[...].astype(jnp.float32)
    g = gamma_ref[...].astype(jnp.float32)
    b = beta_ref[...].astype(jnp.float32)
    S = s_ref[...]
    St = st_ref[...]

    inv_n = jnp.float32(1.0 / feat)
    inv_nm1 = jnp.float32(1.0 / (feat - 1)) if feat > 1 else jnp.float32(jnp.nan)

    # Segmented two-pass mean/var via tiny MXU matmuls (MXU is idle otherwise).
    row_sum = jnp.dot(x, S, preferred_element_type=jnp.float32)       # (R, k)
    mean = row_sum * inv_n
    mean_b = jnp.dot(mean, St, preferred_element_type=jnp.float32)    # (R, lanes)
    diff = x - mean_b
    sq_sum = jnp.dot(diff * diff, S, preferred_element_type=jnp.float32)
    var = sq_sum * inv_nm1                                            # (R, k)
    inv = pl.reciprocal(var + jnp.float32(eps), approx=False)
    inv_b = jnp.dot(inv, St, preferred_element_type=jnp.float32)      # (R, lanes)
    o_ref[...] = (g * diff * inv_b + b).astype(o_ref.dtype)


# ----------------------------------------------------------------------------
# Tiling / pallas_call wrapper for a 2-D (rows_e, lanes) problem
# ----------------------------------------------------------------------------

def _vmem_limit_bytes():
    """Chip-aware VMEM limit: ~48 MiB on v7x (64 MiB VMEM), ~80 MiB on
    v5e/v6e (128 MiB VMEM).  Conservative fallback assumes the smallest VMEM."""
    try:
        info = pltpu.get_tpu_info()
        vmem_cap = int(getattr(info, "vmem_capacity_bytes", 64 * 1024 * 1024))
    except Exception:  # no TPU info available -> assume v7x-sized VMEM
        vmem_cap = 64 * 1024 * 1024
    limit = min(vmem_cap - 16 * 1024 * 1024, 80 * 1024 * 1024)
    return max(limit, 32 * 1024 * 1024)


def _run_2d(x2, gamma2, beta2, *, eps, feat, k, row_tile=None):
    """x2: (rows_e, lanes) with lanes == k*feat; gamma2/beta2: (1, lanes)."""
    rows_e, lanes = x2.shape
    itemsize = jnp.dtype(x2.dtype).itemsize
    sub = max(8, 32 // itemsize)  # sublane multiple: 8 for f32, 16 for bf16

    vmem_limit = _vmem_limit_bytes()

    if row_tile is None:
        # Per-row VMEM: double-buffered in + out tiles (4 * itemsize) plus the
        # live f32 temporaries in the kernel body (~4 for k==1: x, diff, out,
        # slack; ~6 for the folded path: x, diff, diff*diff, mean_b, inv_b,
        # out).
        n_tmp = 4 if k == 1 else 6
        bytes_per_row = lanes * (4 * itemsize + n_tmp * 4)
        budget = (vmem_limit * 3) // 4
        row_tile = max(sub, (budget // bytes_per_row) // sub * sub)
        row_tile = min(row_tile, 8192)  # raised cap: ~4 MiB f32 x-tile at 128 lanes
        # Keep >= 2 grid steps per TensorCore (grid >= ~4): v7x megacore gets
        # pipelined work on both cores, single-core chips keep DMA/compute
        # overlap.  Only binds for medium problems; large ones already split.
        quarter = max(sub, pl.cdiv(pl.cdiv(rows_e, 4), sub) * sub)
        row_tile = min(row_tile, quarter)
    if row_tile >= rows_e:
        row_tile = rows_e  # full-extent block is always layout-legal
    grid = pl.cdiv(rows_e, row_tile)  # partial final block: OOB stores masked

    if k == 1:
        kernel = functools.partial(_layernorm_kernel_k1, eps=eps, feat=feat)
        operands = (x2, gamma2, beta2)
        in_specs = [
            pl.BlockSpec((row_tile, lanes), lambda i: (i, 0)),
            pl.BlockSpec((1, lanes), lambda i: (0, 0)),  # gamma stays resident
            pl.BlockSpec((1, lanes), lambda i: (0, 0)),  # beta stays resident
        ]
    else:
        # Segment-select matrices built once here (tiny), resident in VMEM.
        S = np.repeat(np.eye(k, dtype=np.float32), feat, axis=0)   # (lanes, k)
        St = np.ascontiguousarray(S.T)                              # (k, lanes)
        kernel = functools.partial(_layernorm_kernel_folded, eps=eps, feat=feat)
        operands = (x2, gamma2, beta2, jnp.asarray(S), jnp.asarray(St))
        in_specs = [
            pl.BlockSpec((row_tile, lanes), lambda i: (i, 0)),
            pl.BlockSpec((1, lanes), lambda i: (0, 0)),
            pl.BlockSpec((1, lanes), lambda i: (0, 0)),
            pl.BlockSpec((lanes, k), lambda i: (0, 0)),   # S  (resident)
            pl.BlockSpec((k, lanes), lambda i: (0, 0)),   # St (resident)
        ]

    return pl.pallas_call(
        kernel,
        out_shape=jax.ShapeDtypeStruct((rows_e, lanes), x2.dtype),
        grid_spec=pltpu.PrefetchScalarGridSpec(
            num_scalar_prefetch=0,
            grid=(grid,),
            in_specs=in_specs,
            out_specs=pl.BlockSpec((row_tile, lanes), lambda i: (i, 0)),
        ),
        compiler_params=pltpu.CompilerParams(
            dimension_semantics=("parallel",),
            vmem_limit_bytes=vmem_limit,
        ),
    )(*operands)


# ----------------------------------------------------------------------------
# Public entry point
# ----------------------------------------------------------------------------

def layernorm_pallas(x, gamma, beta, eps=1e-6, row_tile=None):
    """x: (..., features); gamma, beta: (features,)."""
    orig_shape = x.shape
    feat = orig_shape[-1]
    rows = math.prod(orig_shape[:-1]) if len(orig_shape) > 1 else 1
    eps = float(eps)

    x2 = x.reshape(rows, feat)
    gamma1 = gamma.reshape(1, feat)
    beta1 = beta.reshape(1, feat)

    # Lane-folding factor: smallest k such that (k*feat) % 128 == 0
    # (k = lcm(feat,128)/feat), i.e. lane-dense loads and unmasked 128-lane
    # stores.  Capped so the folded width stays modest.
    k = 1
    if 1 < feat < 128:
        k_cand = 128 // math.gcd(feat, 128)
        if k_cand * feat <= 1024 and rows >= k_cand:
            k = k_cand

    if k == 1:
        out2 = _run_2d(x2, gamma1, beta1, eps=eps, feat=feat, k=1,
                       row_tile=row_tile)
    else:
        lanes = k * feat
        gfold = jnp.tile(gamma.reshape(-1), (k,)).reshape(1, lanes)
        bfold = jnp.tile(beta.reshape(-1), (k,)).reshape(1, lanes)

        rows_main = (rows // k) * k
        xm = x2[:rows_main].reshape(rows_main // k, lanes)  # row-major fold
        out_main = _run_2d(xm, gfold, bfold, eps=eps, feat=feat, k=k,
                           row_tile=row_tile).reshape(rows_main, feat)

        if rows_main == rows:
            out2 = out_main
        else:
            # Tiny unfolded tail (< k rows) so the bulk keeps lane-dense I/O.
            out_tail = _run_2d(x2[rows_main:], gamma1, beta1,
                               eps=eps, feat=feat, k=1)
            out2 = jnp.concatenate([out_main, out_tail], axis=0)

    return out2.reshape(orig_shape)


# ----------------------------------------------------------------------------
# Demo / self-check
# ----------------------------------------------------------------------------

def _reference(x, gamma, beta, eps):
    mean = jnp.mean(x, axis=-1, keepdims=True)
    n = x.shape[-1]
    var = jnp.sum((x - mean) ** 2, axis=-1, keepdims=True) / (n - 1)
    return gamma * (x - mean) / (var + eps) + beta


if __name__ == "__main__":
    key = jax.random.PRNGKey(0)
    batch, seq, hidden = 2, 8, 32  # features = hidden = 32

    x = jax.random.normal(key, (batch, seq, hidden), dtype=jnp.float32)

    # Deterministic parameter init, exactly as the module's __init__:
    gamma = jnp.ones((hidden,), dtype=jnp.float32)
    beta = jnp.zeros((hidden,), dtype=jnp.float32)

    out = jax.block_until_ready(layernorm_pallas(x, gamma, beta, eps=1e-6))
    ref = _reference(x, gamma, beta, 1e-6)
    assert jnp.allclose(out, ref, atol=1e-4, rtol=1e-4), "mismatch (folded path)"

    # Lane-dense k == 1 path (feat == 128) with a multi-step parallel grid.
    x_big = jax.random.normal(jax.random.PRNGKey(1), (4, 200, 128), jnp.float32)
    g_big = jnp.ones((128,), jnp.float32)
    b_big = jnp.zeros((128,), jnp.float32)
    out_big = jax.block_until_ready(layernorm_pallas(x_big, g_big, b_big))
    assert jnp.allclose(out_big, _reference(x_big, g_big, b_big, 1e-6),
                        atol=1e-4, rtol=1e-4), "mismatch (k==1 path)"

    # lcm-based folding (feat=48 -> k=8, lanes=384) with a non-divisible row
    # count (rows=10): folded prefix (8 rows) + k==1 tail (2 rows).
    x_odd = jax.random.normal(jax.random.PRNGKey(2), (5, 2, 48), jnp.float32)
    g_odd = jax.random.normal(jax.random.PRNGKey(3), (48,), jnp.float32)
    b_odd = jax.random.normal(jax.random.PRNGKey(4), (48,), jnp.float32)
    out_odd = jax.block_until_ready(layernorm_pallas(x_odd, g_odd, b_odd))
    assert jnp.allclose(out_odd, _reference(x_odd, g_odd, b_odd, 1e-6),
                        atol=1e-4, rtol=1e-4), "mismatch (prefix+tail path)"

    print("KERNEL_OK")
</pallas_src>

<mosaic_0001>
module attributes {stable_mosaic.version = 11 : i64} {
  func.func @_layernorm_kernel_folded(%arg0: i32, %arg1: memref<4x128xf32, #tpu.memory_space<vmem>>, %arg2: memref<1x128xf32, #tpu.memory_space<vmem>>, %arg3: memref<1x128xf32, #tpu.memory_space<vmem>>, %arg4: memref<128x4xf32, #tpu.memory_space<vmem>>, %arg5: memref<4x128xf32, #tpu.memory_space<vmem>>, %arg6: memref<4x128xf32, #tpu.memory_space<vmem>>) attributes {dimension_semantics = [#tpu.dimension_semantics<parallel>], iteration_bounds = array<i64: 1>, scalar_prefetch = 0 : i64, scratch_operands = 0 : i64, tpu.core_type = #tpu.core_type<tc>, window_params = [{transform_indices = @transform_0, window_bounds = array<i64: 4, 128>}, {pipeline_mode = #tpu.pipeline_mode<synchronous>, transform_indices = @transform_1, window_bounds = array<i64: 1, 128>}, {pipeline_mode = #tpu.pipeline_mode<synchronous>, transform_indices = @transform_2, window_bounds = array<i64: 1, 128>}, {pipeline_mode = #tpu.pipeline_mode<synchronous>, transform_indices = @transform_3, window_bounds = array<i64: 128, 4>}, {pipeline_mode = #tpu.pipeline_mode<synchronous>, transform_indices = @transform_4, window_bounds = array<i64: 4, 128>}, {transform_indices = @transform_5, window_bounds = array<i64: 4, 128>}]} {
    %c0 = arith.constant 0 : index
    %c0_0 = arith.constant 0 : index
    %0 = vector.load %arg1[%c0, %c0_0] : memref<4x128xf32, #tpu.memory_space<vmem>>, vector<4x128xf32>
    %c0_1 = arith.constant 0 : index
    %c0_2 = arith.constant 0 : index
    %1 = vector.load %arg2[%c0_1, %c0_2] : memref<1x128xf32, #tpu.memory_space<vmem>>, vector<1x128xf32>
    %c0_3 = arith.constant 0 : index
    %c0_4 = arith.constant 0 : index
    %2 = vector.load %arg3[%c0_3, %c0_4] : memref<1x128xf32, #tpu.memory_space<vmem>>, vector<1x128xf32>
    %c0_5 = arith.constant 0 : index
    %c0_6 = arith.constant 0 : index
    %3 = vector.load %arg4[%c0_5, %c0_6] : memref<128x4xf32, #tpu.memory_space<vmem>>, vector<128x4xf32>
    %c0_7 = arith.constant 0 : index
    %c0_8 = arith.constant 0 : index
    %4 = vector.load %arg5[%c0_7, %c0_8] : memref<4x128xf32, #tpu.memory_space<vmem>>, vector<4x128xf32>
    %cst = arith.constant dense<0.000000e+00> : vector<4x4xf32>
    %5 = tpu.matmul %0, %3, %cst {dimension_numbers = #tpu.dot_dimension_numbers<[1], [0], [0], [1], [0, 0, 1, 1], [], []>} : vector<4x128xf32>, vector<128x4xf32>, vector<4x4xf32> -> vector<4x4xf32>
    %cst_9 = arith.constant 3.125000e-02 : f32
    %6 = vector.broadcast %cst_9 : f32 to vector<4x4xf32>
    %7 = arith.mulf %5, %6 : vector<4x4xf32>
    %cst_10 = arith.constant dense<0.000000e+00> : vector<4x128xf32>
    %8 = tpu.matmul %7, %4, %cst_10 {dimension_numbers = #tpu.dot_dimension_numbers<[1], [0], [0], [1], [0, 0, 1, 1], [], []>} : vector<4x4xf32>, vector<4x128xf32>, vector<4x128xf32> -> vector<4x128xf32>
    %9 = arith.subf %0, %8 : vector<4x128xf32>
    %10 = arith.mulf %9, %9 : vector<4x128xf32>
    %cst_11 = arith.constant dense<0.000000e+00> : vector<4x4xf32>
    %11 = tpu.matmul %10, %3, %cst_11 {dimension_numbers = #tpu.dot_dimension_numbers<[1], [0], [0], [1], [0, 0, 1, 1], [], []>} : vector<4x128xf32>, vector<128x4xf32>, vector<4x4xf32> -> vector<4x4xf32>
    %cst_12 = arith.constant 0.0322580636 : f32
    %12 = vector.broadcast %cst_12 : f32 to vector<4x4xf32>
    %13 = arith.mulf %11, %12 : vector<4x4xf32>
    %cst_13 = arith.constant 9.99999997E-7 : f32
    %14 = vector.broadcast %cst_13 : f32 to vector<4x4xf32>
    %15 = arith.addf %13, %14 : vector<4x4xf32>
    %16 = tpu.reciprocal %15 : vector<4x4xf32> -> vector<4x4xf32>
    %cst_14 = arith.constant dense<0.000000e+00> : vector<4x128xf32>
    %17 = tpu.matmul %16, %4, %cst_14 {dimension_numbers = #tpu.dot_dimension_numbers<[1], [0], [0], [1], [0, 0, 1, 1], [], []>} : vector<4x4xf32>, vector<4x128xf32>, vector<4x128xf32> -> vector<4x128xf32>
    %18 = vector.broadcast %1 : vector<1x128xf32> to vector<4x128xf32>
    %19 = arith.mulf %18, %9 : vector<4x128xf32>
    %20 = arith.mulf %19, %17 : vector<4x128xf32>
    %21 = vector.broadcast %2 : vector<1x128xf32> to vector<4x128xf32>
    %22 = arith.addf %20, %21 : vector<4x128xf32>
    %c0_15 = arith.constant 0 : index
    %c0_16 = arith.constant 0 : index
    %23 = vector.load %arg6[%c0_15, %c0_16] : memref<4x128xf32, #tpu.memory_space<vmem>>, vector<4x128xf32>
    tpu.vector_store %arg6[%c0_15, %c0_16], %22 {strides = array<i32>} : memref<4x128xf32, #tpu.memory_space<vmem>>, vector<4x128xf32>,
    return
  }
  func.func @transform_0(%arg0: i32) -> (i32, i32) {
    %c0_i32 = arith.constant 0 : i32
    %c0_i32_0 = arith.constant 0 : i32
    return %arg0, %c0_i32 : i32, i32
  }
  func.func @transform_1(%arg0: i32) -> (i32, i32) {
    %c0_i32 = arith.constant 0 : i32
    %c0_i32_0 = arith.constant 0 : i32
    %c0_i32_1 = arith.constant 0 : i32
    return %c0_i32, %c0_i32_0 : i32, i32
  }
  func.func @transform_2(%arg0: i32) -> (i32, i32) {
    %c0_i32 = arith.constant 0 : i32
    %c0_i32_0 = arith.constant 0 : i32
    %c0_i32_1 = arith.constant 0 : i32
    return %c0_i32, %c0_i32_0 : i32, i32
  }
  func.func @transform_3(%arg0: i32) -> (i32, i32) {
    %c0_i32 = arith.constant 0 : i32
    %c0_i32_0 = arith.constant 0 : i32
    %c0_i32_1 = arith.constant 0 : i32
    return %c0_i32, %c0_i32_0 : i32, i32
  }
  func.func @transform_4(%arg0: i32) -> (i32, i32) {
    %c0_i32 = arith.constant 0 : i32
    %c0_i32_0 = arith.constant 0 : i32
    %c0_i32_1 = arith.constant 0 : i32
    return %c0_i32, %c0_i32_0 : i32, i32
  }
  func.func @transform_5(%arg0: i32) -> (i32, i32) {
    %c0_i32 = arith.constant 0 : i32
    %c0_i32_0 = arith.constant 0 : i32
    return %arg0, %c0_i32 : i32, i32
  }
}

</mosaic_0001>

<bundles_post_ra>
// kernel: tpu_custom_call.1
= control target key start
LH: loop header
LB: loop body
LE: loop exit
PB: predicated region body
PF: predicated region fallthrough
CT: control target
= control target key end

     0   :  { %v570_v3 = vmov 0.0|0.0   ;;  %vm571_vm0 = vmmov 0   ;;  %v572_v6 = vmov 0.0   ;;  %s698_s0 = inlined_call_operand.vmem [shape: f32[4,128], index: 0, kind: input, shape index: {}]   ;;  %s699_s1 = inlined_call_operand.vmem [shape: f32[1,128], index: 1, kind: input, shape index: {}]   ;;  %s700_s2 = inlined_call_operand.vmem [shape: f32[1,128], index: 2, kind: input, shape index: {}]   ;;  %s701_s3 = inlined_call_operand.vmem [shape: f32[128,4], index: 3, kind: input, shape index: {}]   ;;  %s702_s4 = inlined_call_operand.vmem [shape: f32[4,128], index: 4, kind: input, shape index: {}]   ;;  %s703_s5 = inlined_call_operand.hbm [shape: f32[4,128], index: 5, kind: output, shape index: {}]  }
   0x1   :  { %v24_v0 = vld [vmem:[%s701_s3] sm:$0xff]  ;;  %v25_v1 = vld [vmem:[%s701_s3 + $0x8] sm:$0xff]  ;;  %v26_v2 = vld [vmem:[%s701_s3 + $0x10] sm:$0xff]  ;;  %492 = vmatprep.subr.bf16.mxu0 %v570_v3  ;;  %444 = vmatprep.mubr.msk.f32.mxu0 %vm571_vm0, %v572_v6 }
   0x2   :  { %v493_v4 = vpack.c.bf16 %v25_v1, %v24_v0  ;;  %v27_v5 = vld [vmem:[%s701_s3 + $0x18] sm:$0xff]  ;;  %447 = vmatprep.subr.mxu1 %v572_v6  ;;  %449 = vmatprep.mubr.msk.f32.mxu1 %vm571_vm0, %v572_v6  ;;  %v28_v8 = vld [vmem:[%s701_s3 + $0x20] sm:$0xff]  ;;  %v29_v9 = vld [vmem:[%s701_s3 + $0x28] sm:$0xff] }
   0x3   :  { %v496_v7 = vpack.c.bf16 %v27_v5, %v26_v2 }
   0x4   :  { %494 = vmatpush3.bf16.msra.mxu0 %v493_v4 }
   0x5   :  { %495 = vmatprep.subr.bf16.mxu0 %v570_v3 }
   0x6   :  { %10 = vsyncpa [#allocation3], 0  ;;  %v499_v10 = vpack.c.bf16 %v29_v9, %v28_v8  ;;  %v30_v11 = vld [vmem:[%s701_s3 + $0x30] sm:$0xff]  ;;  %v31_v12 = vld [vmem:[%s701_s3 + $0x38] sm:$0xff]  ;;  %vm116_vm1 = vcmask 1043456   ;;  %vm112_vm2 = vcmask 31744  }
   0x7   :  { %v502_v13 = vpack.c.bf16 %v31_v12, %v30_v11  ;;  %v32_v14 = vld [vmem:[%s701_s3 + $0x40] sm:$0xff]  ;;  %v33_v15 = vld [vmem:[%s701_s3 + $0x48] sm:$0xff]  ;;  %v34_v17 = vld [vmem:[%s701_s3 + $0x50] sm:$0xff]  ;;  %s573_s30 = smov [#allocation2]  }
   0x8   :  { %497 = vmatpush3.bf16.msra.mxu0 %v496_v7  ;;  %v505_v16 = vpack.c.bf16 %v33_v15, %v32_v14  ;;  %v35_v18 = vld [vmem:[%s701_s3 + $0x58] sm:$0xff]  ;;  %v36_v20 = vld [vmem:[%s701_s3 + $0x60] sm:$0xff]  ;;  %v37_v21 = vld [vmem:[%s701_s3 + $0x68] sm:$0xff]  ;;  %s360_s6 = sshll.u32 %s573_s30, 4  ;;  %s361_s6 = int_to_ptr.vmem [resolvable:$true] %s360_s6 }
   0x9   :  { %498 = vmatprep.subr.bf16.mxu0 %v570_v3  ;;  %v508_v19 = vpack.c.bf16 %v35_v18, %v34_v17  ;;  %v511_v22 = vpack.c.bf16 %v37_v21, %v36_v20  ;;  %v38_v23 = vld [vmem:[%s701_s3 + $0x70] sm:$0xff]  ;;  %v39_v24 = vld [vmem:[%s701_s3 + $0x78] sm:$0xff]  ;;  %v21_v26 = vld [vmem:[%s698_s0] sm:$0xf]  ;;  %s546_s7 = scalar_lea.vmem %s361_s6, 64  ;;  %p551_p1 = scmp.lt.s32.totalorder %s361_s6, %s361_s6 }
   0xa   :  { %v514_v25 = vpack.c.bf16 %v39_v24, %v38_v23  ;;  %v40_v27 = vld [vmem:[%s702_s4] sm:$0xf]  ;;  %p547_p0 = scmp.ne.s32.totalorder %s361_s6, %s546_s7  ;;  %p552_p2 = scmp.lt.s32.totalorder %s546_s7, %s546_s7 }
   0xb   :  { %448 = vmatpush3.msk.msra.mxu1 %vm116_vm1, %v40_v27  ;;  %v372_v40 = vld [vmem:[%s699_s1] ss:$0 sm:$0xff] }
   0xc   :  { %500 = vmatpush3.bf16.msra.mxu0 %v499_v10  ;;  %516 = vmatprep.subr.bf16.mxu1 %v570_v3  ;;  %v373_v43 = vld [vmem:[%s700_s2] ss:$0 sm:$0xff]  ;;  %p553_p3 = por %p552_p2, %p551_p1 }
   0xd   :  { %501 = vmatprep.subr.bf16.mxu0 %v570_v3 }
   0xe   :  { %p554_p4 = pnand %p553_p3, %p547_p0 }
  0x10   :  { %503 = vmatpush3.bf16.msra.mxu0 %v502_v13 }
  0x11   :  { %504 = vmatprep.subr.bf16.mxu0 %v570_v3 }
  0x14   :  { %506 = vmatpush3.bf16.msra.mxu0 %v505_v16 }
  0x15   :  { %507 = vmatprep.subr.bf16.mxu0 %v570_v3 }
  0x18   :  { %509 = vmatpush3.bf16.msra.mxu0 %v508_v19 }
  0x19   :  { %510 = vmatprep.subr.bf16.mxu0 %v570_v3 }
  0x1c   :  { %512 = vmatpush3.bf16.msra.mxu0 %v511_v22 }
  0x1d   :  { %513 = vmatprep.subr.bf16.mxu0 %v570_v3 }
  0x20   :  { %515 = vmatpush3.bf16.msra.mxu0 %v514_v25 }
  0x21   :  { %487 = vmatprep.subr.mxu0 %v572_v6 }
  0x23   :  { %445 = vmatmul.mubr.f32.vlgmr.msra.gmra.mrb[0].mxu0 %v21_v26 }
  0x24   :  { %489 = vmatprep.mubr.msk.f32.mxu0 %vm571_vm0, %v572_v6  ;;  %488 = vmatpush3.msk.msra.mxu0 %vm116_vm1, %v40_v27 }
  0xf6   :  { %v107_v28 = vpop.f32.mrb[0].mxu0 }
  0xf7   :  { %v111_v29 = vmul.f32 0.03125, %v107_v28  ;;  %v446_v30 = vpop.f32.mrb[1].mxu0 }
  0xf9   :  { %450 = vmatmul.mubr.msk.f32.vlgmr.msra.gmra.mrb[0].mxu1 %vm112_vm2, %v111_v29 }
  0xfa   :  { %518 = vmatpush3.bf16.msra.mxu1 %v493_v4  ;;  %484 = vmatprep.mubr.msk.f32.mxu1 %vm571_vm0, %v572_v6 }
  0xfb   :  { %519 = vmatprep.subr.bf16.mxu1 %v570_v3 }
  0xfe   :  { %521 = vmatpush3.bf16.msra.mxu1 %v496_v7 }
  0xff   :  { %522 = vmatprep.subr.bf16.mxu1 %v570_v3 }
 0x102   :  { %524 = vmatpush3.bf16.msra.mxu1 %v499_v10 }
 0x103   :  { %525 = vmatprep.subr.bf16.mxu1 %v570_v3 }
 0x106   :  { %527 = vmatpush3.bf16.msra.mxu1 %v502_v13 }
 0x107   :  { %528 = vmatprep.subr.bf16.mxu1 %v570_v3 }
 0x10a   :  { %530 = vmatpush3.bf16.msra.mxu1 %v505_v16 }
 0x10b   :  { %531 = vmatprep.subr.bf16.mxu1 %v570_v3 }
 0x10e   :  { %533 = vmatpush3.bf16.msra.mxu1 %v508_v19 }
 0x10f   :  { %534 = vmatprep.subr.bf16.mxu1 %v570_v3 }
 0x112   :  { %536 = vmatpush3.bf16.msra.mxu1 %v511_v22 }
 0x113   :  { %537 = vmatprep.subr.bf16.mxu1 %v570_v3 }
 0x116   :  { %539 = vmatpush3.bf16.msra.mxu1 %v514_v25 }
 0x1cc   :  { %v186_v31 = vpop.f32.mrb[0].mxu1 }
 0x1cd   :  { %v190_v32 = vsub.f32 %v21_v26, %v186_v31  ;;  %v451_v33 = vpop.f32.mrb[1].mxu1 }
 0x1cf   :  { %v191_v34 = vmul.f32 %v190_v32, %v190_v32  ;;  %v344_v41 = vmul.f32 %v372_v40, %v190_v32 }
 0x1d1   :  { %485 = vmatmul.mubr.f32.vlgmr.msra.gmra.mrb[2].mxu1 %v191_v34 }
 0x2a4   :  { %v258_v35 = vpop.f32.mrb[2].mxu1 }
 0x2a5   :  { %v262_v36 = vmul.f32 0.032258064, %v258_v35  ;;  %v486_v37 = vpop.f32.mrb[3].mxu1 }
 0x2a7   :  { %v263_v38 = vadd.f32 1e-06, %v262_v36 }
 0x2a9   :  { %544 = vrcp.f32 %v263_v38 }
 0x2b3   :  { %v545_v39 = vpop.eup %544 }
 0x2b4   :  { %490 = vmatmul.mubr.msk.f32.vlgmr.msra.gmra.mrb[2].mxu0 %vm112_vm2, %v545_v39 }
 0x387   :  { %v334_v42 = vpop.f32.mrb[2].mxu0 }
 0x388   :  { %v345_v44 = vmul.f32 %v344_v41, %v334_v42  ;;  %v491_v45 = vpop.f32.mrb[3].mxu0 }
 0x38a   :  { %v352_v46 = vadd.f32 %v373_v43, %v345_v44 }
 0x38c   :  { %353 = vst [vmem:[#allocation2] sm:$0xf] %v352_v46 }
 0x38d   :  { %557 = shalt.err (!%p554_p4)
}
 0x38e   :  { %s558_s9 = scalar_lea.hbm %s703_s5, 64 }
 0x38f   :  { %p559_p5 = scmp.ne.s32.totalorder %s703_s5, %s558_s9  ;;  %p562_p6 = scmp.lt.u32.totalorder %s558_s9, %s703_s5 }
 0x391   :  { %p564_p7 = pnand %p562_p6, %p559_p5 }
 0x393   :  { %567 = shalt.err (!%p564_p7)
}
 0x394   :  { %363 = dma.vmem_to_hbm [thread:$0]  %s361_s6, 64, %s703_s5, [#allocation3]  }
 0x395   :  { %568 = dma.done.wait [#allocation3], 64  }
 0x396   :  { %569 = vsyncadd [#allocation3], 4294967232 }
 0x397   :  { %367 = vsyncpa [#allocation3], 1 }

</bundles_post_ra>
